<compile_context>
chip_gen: v7x
topology: tpu7x:2x2x1
jax: 0.10.0
libtpu: 0.0.40
codegen_flags: <defaults>
</compile_context>

<pallas_src>
import math
from functools import partial

import jax
import jax.numpy as jnp
from jax.experimental import pallas as pl
from jax.experimental.pallas import tpu as pltpu


# ----------------------------------------------------------------------------
# Kernels
# ----------------------------------------------------------------------------
def _tape_add_kernel(x_ref, pe_ref, o_ref):
    # eval mode: dropout is identity -> broadcasted add (pe broadcasts over batch)
    o_ref[...] = (x_ref[...] + pe_ref[...]).astype(o_ref.dtype)


def _tape_dropout_hw_kernel(seed_ref, x_ref, pe_ref, o_ref, *,
                            threshold, inv_keep, grid_rank):
    # training mode on a real TPU: inverted dropout via the hardware PRNG.
    # Unique stream per grid step: base seed + linear step id as a second seed word.
    gid = pl.program_id(0)
    for ax in range(1, grid_rank):
        gid = gid * pl.num_programs(ax) + pl.program_id(ax)
    pltpu.prng_seed(seed_ref[0], gid)
    y = x_ref[...] + pe_ref[...]
    bits = pltpu.prng_random_bits(y.shape)
    if bits.dtype != jnp.uint32:            # hygiene: don't assume the bits dtype
        bits = pltpu.bitcast(bits, jnp.uint32)
    keep = bits >= jnp.uint32(threshold)    # keep with probability (1 - p)
    o_ref[...] = jnp.where(keep, y * inv_keep, 0).astype(o_ref.dtype)


def _tape_dropout_bits_kernel(x_ref, pe_ref, bits_ref, o_ref, *, threshold, inv_keep):
    # portable training path (CPU / interpret): random bits precomputed in the wrapper
    y = x_ref[...] + pe_ref[...]
    keep = bits_ref[...] >= jnp.uint32(threshold)
    o_ref[...] = jnp.where(keep, y * inv_keep, 0).astype(o_ref.dtype)


# ----------------------------------------------------------------------------
# Parameter setup (deterministic, mirrors tAPE.__init__)
# ----------------------------------------------------------------------------
def make_tape_pe(d_model, max_len=1024, scale_factor=1.0, dtype=jnp.float32):
    assert d_model % 2 == 0, "tAPE requires an even d_model"
    position = jnp.arange(0, max_len, dtype=jnp.float32)[:, None]               # [L, 1]
    div_term = jnp.exp(
        jnp.arange(0, d_model, 2, dtype=jnp.float32) * (-math.log(10000.0) / d_model)
    )                                                                            # [D/2]
    angles = position * div_term * (d_model / max_len)                           # [L, D/2]
    pe = jnp.zeros((max_len, d_model), dtype=jnp.float32)
    pe = pe.at[:, 0::2].set(jnp.sin(angles))
    pe = pe.at[:, 1::2].set(jnp.cos(angles))
    return (scale_factor * pe).astype(dtype)                                    # [L, D]


# ----------------------------------------------------------------------------
# Tiling helpers
# ----------------------------------------------------------------------------
_SUBLANE = {4: 8, 2: 16, 1: 32}   # dtype-aware sublane multiple


def _cdiv(a, b):
    return -(-a // b)


def _chip_info():
    """Returns (small_vmem_chip, on_tpu_backend)."""
    if jax.default_backend() != "tpu":
        return True, False
    try:
        cap = pltpu.get_tpu_info().vmem_capacity_bytes
        return cap <= (64 << 20), True     # v7x-class: 64 MiB physical VMEM
    except Exception:
        return True, True                   # be conservative if the query fails
    return True, True


# ----------------------------------------------------------------------------
# Wrapper
# ----------------------------------------------------------------------------
def tape_forward(x, pe, *, dropout_p=0.1, train=False, seed=0, donate_x=False):
    """x: [batch, seq_len, d_model]; pe: [seq_len, d_model] (seq_len == max_len)."""
    B, S, D = x.shape
    assert pe.shape == (S, D), "seq_len of x must equal max_len of the PE buffer"
    if pe.dtype != x.dtype:
        pe = pe.astype(x.dtype)   # avoid silent f32 promotion inside the kernel

    itemsize = jnp.dtype(x.dtype).itemsize
    m = _SUBLANE.get(itemsize, 8)
    small_vmem, on_tpu = _chip_info()

    # DMA-amortizing tile targets (review: ~4 MiB reaches ~85% of HBM roofline);
    # keep v7x (64 MiB physical VMEM) on a tighter budget than v5e/v6e (128 MiB).
    target_bytes = (4 << 20) if small_vmem else (8 << 20)
    vmem_cap = (40 << 20) if small_vmem else (96 << 20)

    # NOTE: for best store throughput D should be a multiple of 128; other values
    # are correct but lower to masked (vst.msk) stores.

    # Fold the batch into the block when even a minimum-height folded tile fits.
    fold_batch = (m * B * D * itemsize) <= target_bytes or S <= m
    row_bytes = (B if fold_batch else 1) * D * itemsize

    rows = max(1, target_bytes // max(1, row_bytes))
    if rows >= S:
        TS = S
    else:
        TS = min(S, max(m, (rows // m) * m))   # multiple of the sublane count
    n_s = _cdiv(S, TS)

    # v7x 2-TC balance: if the folded grid collapsed to one step but the slab is
    # big, split the seq axis in two (both halves stay >= ~1 MiB).
    if fold_batch and n_s == 1 and S >= 2 * m and S * row_bytes >= (2 << 20):
        TS = min(S, _cdiv(_cdiv(S, 2), m) * m)
        n_s = _cdiv(S, TS)

    if fold_batch:
        grid = (n_s,)
        dim_sems = ("parallel",)
        x_spec = pl.BlockSpec((B, TS, D), lambda s, *_: (0, s, 0))
        pe_spec = pl.BlockSpec((TS, D), lambda s, *_: (s, 0))
        out_spec = pl.BlockSpec((B, TS, D), lambda s, *_: (0, s, 0))
        bits_spec = pl.BlockSpec((B, TS, D), lambda s, *_: (0, s, 0))
    else:
        # seq outermost -> pe block index is constant across the inner batch loop,
        # so its DMA is skipped after the first batch step of each seq tile.
        grid = (n_s, B)
        dim_sems = ("parallel", "parallel")
        x_spec = pl.BlockSpec((None, TS, D), lambda s, b, *_: (b, s, 0))
        pe_spec = pl.BlockSpec((TS, D), lambda s, b, *_: (s, 0))
        out_spec = pl.BlockSpec((None, TS, D), lambda s, b, *_: (b, s, 0))
        bits_spec = pl.BlockSpec((None, TS, D), lambda s, b, *_: (b, s, 0))

    # VMEM budget: double-buffered x + out + pe, plus a tile of uint32 PRNG/mask
    # bits for the training paths, plus headroom.
    x_tile = (B if fold_batch else 1) * TS * D * itemsize
    pe_tile = TS * D * itemsize
    bits_tile = (B if fold_batch else 1) * TS * D * 4
    needed = 2 * (2 * x_tile + pe_tile + bits_tile) + (2 << 20)
    vmem_bytes = int(min(vmem_cap, max(8 << 20, needed)))
    cparams = pltpu.CompilerParams(dimension_semantics=dim_sems,
                                   vmem_limit_bytes=vmem_bytes)
    out_shape = jax.ShapeDtypeStruct((B, S, D), x.dtype)

    io_bytes = 2 * B * S * D * itemsize + S * D * itemsize

    if (not train) or dropout_p == 0.0:
        return pl.pallas_call(
            _tape_add_kernel,
            out_shape=out_shape,
            grid_spec=pltpu.PrefetchScalarGridSpec(
                num_scalar_prefetch=0, grid=grid,
                in_specs=[x_spec, pe_spec], out_specs=out_spec),
            compiler_params=cparams,
            cost_estimate=pl.CostEstimate(flops=B * S * D, transcendentals=0,
                                          bytes_accessed=io_bytes),
            input_output_aliases=({0: 0} if donate_x else {}),
        )(x, pe)

    if dropout_p >= 1.0:
        return jnp.zeros_like(x)

    threshold = min(int(round(dropout_p * float(2 ** 32))), 2 ** 32 - 1)
    inv_keep = 1.0 / (1.0 - dropout_p)
    cost_drop = pl.CostEstimate(flops=3 * B * S * D, transcendentals=0,
                                bytes_accessed=io_bytes)

    if on_tpu:
        # Hardware-PRNG path: dropout mask generated in-kernel, no extra HBM traffic.
        seed_arr = jnp.array([seed], dtype=jnp.int32)
        kernel = partial(_tape_dropout_hw_kernel, threshold=threshold,
                         inv_keep=inv_keep, grid_rank=len(grid))
        return pl.pallas_call(
            kernel,
            out_shape=out_shape,
            grid_spec=pltpu.PrefetchScalarGridSpec(
                num_scalar_prefetch=1,        # seed lands in SMEM
                grid=grid,
                in_specs=[x_spec, pe_spec], out_specs=out_spec),
            compiler_params=cparams,
            cost_estimate=cost_drop,
            # x is arg index 1 (the prefetched seed is arg 0)
            input_output_aliases=({1: 0} if donate_x else {}),
        )(seed_arr, x, pe)

    # TODO(synk): torch's exact nn.Dropout RNG stream is not reproducible; this
    # portable path (non-TPU backend / interpret mode, where pltpu.prng_seed has
    # no lowering) streams jax.random bits through the kernel instead.
    bits = jax.random.bits(jax.random.PRNGKey(seed), (B, S, D), dtype=jnp.uint32)
    kernel = partial(_tape_dropout_bits_kernel, threshold=threshold, inv_keep=inv_keep)
    return pl.pallas_call(
        kernel,
        out_shape=out_shape,
        grid_spec=pltpu.PrefetchScalarGridSpec(
            num_scalar_prefetch=0, grid=grid,
            in_specs=[x_spec, pe_spec, bits_spec], out_specs=out_spec),
        compiler_params=cparams,
        cost_estimate=cost_drop,
        input_output_aliases=({0: 0} if donate_x else {}),
    )(x, pe, bits)


# ----------------------------------------------------------------------------
# Demo / self-test
# ----------------------------------------------------------------------------
if __name__ == "__main__":
    key = jax.random.PRNGKey(0)

    # small but lane-dense shapes: d_model multiple of 128 keeps stores unmasked
    batch, max_len, d_model = 2, 256, 128
    scale_factor = 1.0
    dropout_p = 0.1

    x = jax.random.normal(key, (batch, max_len, d_model), dtype=jnp.float32)
    pe = make_tape_pe(d_model, max_len=max_len, scale_factor=scale_factor, dtype=x.dtype)

    # eval-mode forward (dropout = identity), matches torch module in .eval()
    out = tape_forward(x, pe, dropout_p=dropout_p, train=False)
    out = jax.block_until_ready(out)

    # pure-JAX reference check
    ref = x + pe[None, :, :]
    assert jnp.allclose(out, ref, atol=1e-6, rtol=1e-6)

    # training-mode forward (stochastic dropout). Values are RNG-dependent, so
    # check structure: every element is either 0 (dropped) or (x + pe) / (1 - p)
    # (kept, inverted-dropout scaled).
    out_tr = tape_forward(x, pe, dropout_p=dropout_p, train=True, seed=42)
    out_tr = jax.block_until_ready(out_tr)
    assert out_tr.shape == x.shape
    scaled = ref / (1.0 - dropout_p)
    ok = jnp.isclose(out_tr, 0.0) | jnp.isclose(out_tr, scaled, atol=1e-5, rtol=1e-5)
    assert bool(jnp.all(ok))

    print("KERNEL_OK")
</pallas_src>

<mosaic_0001>
module attributes {stable_mosaic.version = 11 : i64} {
  func.func @_tape_add_kernel(%arg0: i32, %arg1: memref<2x256x128xf32, #tpu.memory_space<vmem>>, %arg2: memref<256x128xf32, #tpu.memory_space<vmem>>, %arg3: memref<2x256x128xf32, #tpu.memory_space<vmem>>) attributes {dimension_semantics = [#tpu.dimension_semantics<parallel>], iteration_bounds = array<i64: 1>, scalar_prefetch = 0 : i64, scratch_operands = 0 : i64, tpu.core_type = #tpu.core_type<tc>, window_params = [{transform_indices = @transform_0, window_bounds = array<i64: 2, 256, 128>}, {transform_indices = @transform_1, window_bounds = array<i64: 256, 128>}, {transform_indices = @transform_2, window_bounds = array<i64: 2, 256, 128>}]} {
    %c0 = arith.constant 0 : index
    %c0_0 = arith.constant 0 : index
    %c0_1 = arith.constant 0 : index
    %0 = vector.load %arg1[%c0, %c0_0, %c0_1] : memref<2x256x128xf32, #tpu.memory_space<vmem>>, vector<2x256x128xf32>
    %c0_2 = arith.constant 0 : index
    %c0_3 = arith.constant 0 : index
    %1 = vector.load %arg2[%c0_2, %c0_3] : memref<256x128xf32, #tpu.memory_space<vmem>>, vector<256x128xf32>
    %2 = vector.shape_cast %1 : vector<256x128xf32> to vector<1x256x128xf32>
    %3 = vector.broadcast %2 : vector<1x256x128xf32> to vector<2x256x128xf32>
    %4 = arith.addf %0, %3 : vector<2x256x128xf32>
    %c0_4 = arith.constant 0 : index
    %c0_5 = arith.constant 0 : index
    %c0_6 = arith.constant 0 : index
    %5 = vector.load %arg3[%c0_4, %c0_5, %c0_6] : memref<2x256x128xf32, #tpu.memory_space<vmem>>, vector<2x256x128xf32>
    tpu.vector_store %arg3[%c0_4, %c0_5, %c0_6], %4 {strides = array<i32>} : memref<2x256x128xf32, #tpu.memory_space<vmem>>, vector<2x256x128xf32>,
    return
  }
  func.func @transform_0(%arg0: i32) -> (i32, i32, i32) {
    %c0_i32 = arith.constant 0 : i32
    %c0_i32_0 = arith.constant 0 : i32
    %c0_i32_1 = arith.constant 0 : i32
    return %c0_i32, %arg0, %c0_i32_0 : i32, i32, i32
  }
  func.func @transform_1(%arg0: i32) -> (i32, i32) {
    %c0_i32 = arith.constant 0 : i32
    %c0_i32_0 = arith.constant 0 : i32
    return %arg0, %c0_i32 : i32, i32
  }
  func.func @transform_2(%arg0: i32) -> (i32, i32, i32) {
    %c0_i32 = arith.constant 0 : i32
    %c0_i32_0 = arith.constant 0 : i32
    %c0_i32_1 = arith.constant 0 : i32
    return %c0_i32, %arg0, %c0_i32_0 : i32, i32, i32
  }
}

</mosaic_0001>

<bundles_post_ra>
// kernel: tpu_custom_call.1
= control target key start
LH: loop header
LB: loop body
LE: loop exit
PB: predicated region body
PF: predicated region fallthrough
CT: control target
= control target key end

     0   :  { %7 = vsyncpa [#allocation3], 0  ;;  %s552_s0 = inlined_call_operand.hbm [shape: f32[2,256,128], index: 0, kind: input, shape index: {}]   ;;  %s553_s1 = inlined_call_operand.hbm [shape: f32[256,128], index: 1, kind: input, shape index: {}]   ;;  %s554_s2 = inlined_call_operand.hbm [shape: f32[2,256,128], index: 2, kind: output, shape index: {}]  }
   0x1   :  { %8 = vsyncpa [#allocation6], 0 }
   0x2   :  { %9 = vsyncpa [#allocation4], 0  ;;  %s359_s9 = smov [#allocation2]   ;;  %s287_s13 = scalar_lea.hbm %s552_s0, 8192 }
   0x3   :  { %s15_s10 = sshll.u32 %s359_s9, 4  ;;  %p288_p0 = scmp.ne.s32.totalorder %s552_s0, %s287_s13  ;;  %s16_s10 = int_to_ptr.vmem [resolvable:$true] %s15_s10 }
   0x4   :  { %p291_p1 = scmp.lt.u32.totalorder %s287_s13, %s552_s0 }
   0x6   :  { %p293_p2 = pnand %p291_p1, %p288_p0 }
   0x8   :  { %296 = shalt.err (!%p293_p2)
}
   0x9   :  { %s297_s18 = scalar_lea.vmem %s16_s10, 8192  ;;  %p302_p4 = scmp.lt.s32.totalorder %s16_s10, %s16_s10 }
   0xa   :  { %p298_p3 = scmp.ne.s32.totalorder %s16_s10, %s297_s18  ;;  %p303_p5 = scmp.lt.s32.totalorder %s297_s18, %s297_s18 }
   0xc   :  { %p304_p6 = por %p303_p5, %p302_p4 }
   0xe   :  { %p305_p7 = pnand %p304_p6, %p298_p3 }
  0x10   :  { %308 = shalt.err (!%p305_p7)
}
  0x11   :  { %s360_s19 = smov 128   ;;  %s361_s20 = smov 8  }
  0x12   :  { %21 = dma.hbm_to_vmem [thread:$0]  %s552_s0, 8192, %s16_s10, [#allocation3], %s360_s19, %s360_s19, %s361_s20  }
  0x13   :  { %s362_s23 = smov [#allocation5]   ;;  %s309_s27 = scalar_lea.hbm %s553_s1, 4096 }
  0x14   :  { %s27_s24 = sshll.u32 %s362_s23, 4  ;;  %p310_p8 = scmp.ne.s32.totalorder %s553_s1, %s309_s27  ;;  %s28_s24 = int_to_ptr.vmem [resolvable:$true] %s27_s24 }
  0x15   :  { %p313_p9 = scmp.lt.u32.totalorder %s309_s27, %s553_s1 }
  0x17   :  { %p315_p10 = pnand %p313_p9, %p310_p8 }
  0x19   :  { %318 = shalt.err (!%p315_p10)
}
  0x1a   :  { %s319_s4 = scalar_lea.vmem %s28_s24, 4096  ;;  %p324_p12 = scmp.lt.s32.totalorder %s28_s24, %s28_s24 }
  0x1b   :  { %p320_p11 = scmp.ne.s32.totalorder %s28_s24, %s319_s4  ;;  %p325_p13 = scmp.lt.s32.totalorder %s319_s4, %s319_s4 }
  0x1d   :  { %p326_p0 = por %p325_p13, %p324_p12 }
  0x1f   :  { %p327_p1 = pnand %p326_p0, %p320_p11 }
  0x21   :  { %330 = shalt.err (!%p327_p1)
}
  0x22   :  { %33 = dma.hbm_to_vmem [thread:$0]  %s553_s1, 4096, %s28_s24, [#allocation6], %s360_s19, %s360_s19, %s361_s20  }
  0x23   :  { %353 = dma.done.wait [#allocation3], 8192  }
  0x24   :  { %354 = vsyncadd [#allocation3], 4294959104 }
  0x25   :  { %355 = dma.done.wait [#allocation6], 4096  }
  0x26   :  { %356 = vsyncadd [#allocation6], 4294963200  ;;  %v40_v0 = vld [vmem:[#allocation2] sm:$0xff]  ;;  %v41_v2 = vld [vmem:[#allocation2 + $0x8] sm:$0xff]  ;;  %s363_s1 = smov [#allocation7]  }
  0x27   :  { %v409_v1 = vld [vmem:[#allocation5] sm:$0xff]  ;;  %v412_v4 = vld [vmem:[#allocation5 + $0x8] sm:$0xff]  ;;  %v42_v5 = vld [vmem:[#allocation2 + $0x10] sm:$0xff]  ;;  %s269_s6 = sshll.u32 %s363_s1, 4  ;;  %s270_s6 = int_to_ptr.vmem [resolvable:$true] %s269_s6 }
  0x28   :  { %v136_v3 = vadd.f32 %v409_v1, %v40_v0  ;;  %v414_v6 = vld [vmem:[#allocation5 + $0x10] sm:$0xff]  ;;  %v137_v7 = vadd.f32 %v412_v4, %v41_v2  ;;  %v43_v9 = vld [vmem:[#allocation2 + $0x18] sm:$0xff]  ;;  %v44_v11 = vld [vmem:[#allocation2 + $0x20] sm:$0xff]  ;;  %s331_s7 = scalar_lea.vmem %s270_s6, 8192  ;;  %p336_p3 = scmp.lt.s32.totalorder %s270_s6, %s270_s6 }
  0x29   :  { %v138_v8 = vadd.f32 %v414_v6, %v42_v5  ;;  %v418_v10 = vld [vmem:[#allocation5 + $0x18] sm:$0xff]  ;;  %v421_v13 = vld [vmem:[#allocation5 + $0x20] sm:$0xff]  ;;  %v45_v14 = vld [vmem:[#allocation2 + $0x28] sm:$0xff]  ;;  %p332_p2 = scmp.ne.s32.totalorder %s270_s6, %s331_s7  ;;  %p337_p4 = scmp.lt.s32.totalorder %s331_s7, %s331_s7 }
  0x2a   :  { %200 = vst [vmem:[#allocation7] sm:$0xff] %v136_v3  ;;  %v139_v12 = vadd.f32 %v418_v10, %v43_v9  ;;  %v423_v15 = vld [vmem:[#allocation5 + $0x28] sm:$0xff]  ;;  %201 = vst [vmem:[#allocation7 + $0x8] sm:$0xff] %v137_v7  ;;  %v140_v16 = vadd.f32 %v421_v13, %v44_v11  ;;  %v46_v18 = vld [vmem:[#allocation2 + $0x30] sm:$0xff] }
  0x2b   :  { %202 = vst [vmem:[#allocation7 + $0x10] sm:$0xff] %v138_v8  ;;  %v141_v17 = vadd.f32 %v423_v15, %v45_v14  ;;  %v427_v19 = vld [vmem:[#allocation5 + $0x30] sm:$0xff]  ;;  %v47_v20 = vld [vmem:[#allocation2 + $0x38] sm:$0xff]  ;;  %v48_v23 = vld [vmem:[#allocation2 + $0x40] sm:$0xff]  ;;  %p338_p5 = por %p337_p4, %p336_p3 }
  0x2c   :  { %203 = vst [vmem:[#allocation7 + $0x18] sm:$0xff] %v139_v12  ;;  %v142_v21 = vadd.f32 %v427_v19, %v46_v18  ;;  %v430_v22 = vld [vmem:[#allocation5 + $0x38] sm:$0xff]  ;;  %v432_v24 = vld [vmem:[#allocation5 + $0x40] sm:$0xff]  ;;  %204 = vst [vmem:[#allocation7 + $0x20] sm:$0xff] %v140_v16 }
  0x2d   :  { %205 = vst [vmem:[#allocation7 + $0x28] sm:$0xff] %v141_v17  ;;  %v143_v25 = vadd.f32 %v430_v22, %v47_v20  ;;  %v144_v26 = vadd.f32 %v432_v24, %v48_v23  ;;  %v49_v27 = vld [vmem:[#allocation2 + $0x48] sm:$0xff]  ;;  %v50_v29 = vld [vmem:[#allocation2 + $0x50] sm:$0xff]  ;;  %v51_v32 = vld [vmem:[#allocation2 + $0x58] sm:$0xff]  ;;  %p339_p6 = pnand %p338_p5, %p332_p2 }
  0x2e   :  { %v436_v28 = vld [vmem:[#allocation5 + $0x48] sm:$0xff]  ;;  %206 = vst [vmem:[#allocation7 + $0x30] sm:$0xff] %v142_v21  ;;  %v439_v31 = vld [vmem:[#allocation5 + $0x50] sm:$0xff]  ;;  %v441_v33 = vld [vmem:[#allocation5 + $0x58] sm:$0xff] }
  0x2f   :  { %v145_v30 = vadd.f32 %v436_v28, %v49_v27  ;;  %207 = vst [vmem:[#allocation7 + $0x38] sm:$0xff] %v143_v25  ;;  %208 = vst [vmem:[#allocation7 + $0x40] sm:$0xff] %v144_v26  ;;  %v146_v34 = vadd.f32 %v439_v31, %v50_v29  ;;  %v147_v35 = vadd.f32 %v441_v33, %v51_v32  ;;  %v52_v36 = vld [vmem:[#allocation2 + $0x60] sm:$0xff]  ;;  %v53_v38 = vld [vmem:[#allocation2 + $0x68] sm:$0xff] }
  0x30   :  { %v445_v37 = vld [vmem:[#allocation5 + $0x60] sm:$0xff]  ;;  %v448_v40 = vld [vmem:[#allocation5 + $0x68] sm:$0xff]  ;;  %v54_v41 = vld [vmem:[#allocation2 + $0x70] sm:$0xff] }
  0x31   :  { %209 = vst [vmem:[#allocation7 + $0x48] sm:$0xff] %v145_v30  ;;  %v148_v39 = vadd.f32 %v445_v37, %v52_v36  ;;  %v450_v42 = vld [vmem:[#allocation5 + $0x70] sm:$0xff]  ;;  %210 = vst [vmem:[#allocation7 + $0x50] sm:$0xff] %v146_v34  ;;  %v149_v43 = vadd.f32 %v448_v40, %v53_v38  ;;  %v55_v45 = vld [vmem:[#allocation2 + $0x78] sm:$0xff] }
  0x32   :  { %211 = vst [vmem:[#allocation7 + $0x58] sm:$0xff] %v147_v35  ;;  %v150_v44 = vadd.f32 %v450_v42, %v54_v41  ;;  %v454_v46 = vld [vmem:[#allocation5 + $0x78] sm:$0xff]  ;;  %v56_v47 = vld [vmem:[#allocation2 + $0x80] sm:$0xff]  ;;  %v57_v50 = vld [vmem:[#allocation2 + $0x88] sm:$0xff] }
  0x33   :  { %212 = vst [vmem:[#allocation7 + $0x60] sm:$0xff] %v148_v39  ;;  %v151_v48 = vadd.f32 %v454_v46, %v55_v45  ;;  %v457_v49 = vld [vmem:[#allocation5 + $0x80] sm:$0xff]  ;;  %v459_v51 = vld [vmem:[#allocation5 + $0x88] sm:$0xff]  ;;  %213 = vst [vmem:[#allocation7 + $0x68] sm:$0xff] %v149_v43 }
  0x34   :  { %214 = vst [vmem:[#allocation7 + $0x70] sm:$0xff] %v150_v44  ;;  %v152_v52 = vadd.f32 %v457_v49, %v56_v47  ;;  %v153_v53 = vadd.f32 %v459_v51, %v57_v50  ;;  %v58_v54 = vld [vmem:[#allocation2 + $0x90] sm:$0xff]  ;;  %v59_v56 = vld [vmem:[#allocation2 + $0x98] sm:$0xff]  ;;  %v60_v59 = vld [vmem:[#allocation2 + $0xa0] sm:$0xff] }
  0x35   :  { %v463_v55 = vld [vmem:[#allocation5 + $0x90] sm:$0xff]  ;;  %215 = vst [vmem:[#allocation7 + $0x78] sm:$0xff] %v151_v48  ;;  %v466_v58 = vld [vmem:[#allocation5 + $0x98] sm:$0xff]  ;;  %v468_v60 = vld [vmem:[#allocation5 + $0xa0] sm:$0xff] }
  0x36   :  { %v154_v57 = vadd.f32 %v463_v55, %v58_v54  ;;  %216 = vst [vmem:[#allocation7 + $0x80] sm:$0xff] %v152_v52  ;;  %217 = vst [vmem:[#allocation7 + $0x88] sm:$0xff] %v153_v53  ;;  %v155_v61 = vadd.f32 %v466_v58, %v59_v56  ;;  %v156_v62 = vadd.f32 %v468_v60, %v60_v59  ;;  %v61_v63 = vld [vmem:[#allocation2 + $0xa8] sm:$0xff]  ;;  %v62_v2 = vld [vmem:[#allocation2 + $0xb0] sm:$0xff] }
  0x37   :  { %v472_v0 = vld [vmem:[#allocation5 + $0xa8] sm:$0xff]  ;;  %v475_v5 = vld [vmem:[#allocation5 + $0xb0] sm:$0xff]  ;;  %v63_v7 = vld [vmem:[#allocation2 + $0xb8] sm:$0xff] }
  0x38   :  { %218 = vst [vmem:[#allocation7 + $0x90] sm:$0xff] %v154_v57  ;;  %v157_v3 = vadd.f32 %v472_v0, %v61_v63  ;;  %v477_v8 = vld [vmem:[#allocation5 + $0xb8] sm:$0xff]  ;;  %219 = vst [vmem:[#allocation7 + $0x98] sm:$0xff] %v155_v61  ;;  %v158_v9 = vadd.f32 %v475_v5, %v62_v2  ;;  %v64_v12 = vld [vmem:[#allocation2 + $0xc0] sm:$0xff] }
  0x39   :  { %220 = vst [vmem:[#allocation7 + $0xa0] sm:$0xff] %v156_v62  ;;  %v159_v11 = vadd.f32 %v477_v8, %v63_v7  ;;  %v481_v14 = vld [vmem:[#allocation5 + $0xc0] sm:$0xff]  ;;  %v65_v16 = vld [vmem:[#allocation2 + $0xc8] sm:$0xff]  ;;  %v66_v20 = vld [vmem:[#allocation2 + $0xd0] sm:$0xff] }
  0x3a   :  { %221 = vst [vmem:[#allocation7 + $0xa8] sm:$0xff] %v157_v3  ;;  %v160_v17 = vadd.f32 %v481_v14, %v64_v12  ;;  %v484_v18 = vld [vmem:[#allocation5 + $0xc8] sm:$0xff]  ;;  %v486_v21 = vld [vmem:[#allocation5 + $0xd0] sm:$0xff]  ;;  %222 = vst [vmem:[#allocation7 + $0xb0] sm:$0xff] %v158_v9 }
  0x3b   :  { %223 = vst [vmem:[#allocation7 + $0xb8] sm:$0xff] %v159_v11  ;;  %v161_v23 = vadd.f32 %v484_v18, %v65_v16  ;;  %v162_v25 = vadd.f32 %v486_v21, %v66_v20  ;;  %v67_v26 = vld [vmem:[#allocation2 + $0xd8] sm:$0xff]  ;;  %v68_v29 = vld [vmem:[#allocation2 + $0xe0] sm:$0xff]  ;;  %v69_v34 = vld [vmem:[#allocation2 + $0xe8] sm:$0xff] }
  0x3c   :  { %v490_v27 = vld [vmem:[#allocation5 + $0xd8] sm:$0xff]  ;;  %224 = vst [vmem:[#allocation7 + $0xc0] sm:$0xff] %v160_v17  ;;  %v493_v32 = vld [vmem:[#allocation5 + $0xe0] sm:$0xff]  ;;  %v495_v35 = vld [vmem:[#allocation5 + $0xe8] sm:$0xff] }
  0x3d   :  { %v163_v30 = vadd.f32 %v490_v27, %v67_v26  ;;  %225 = vst [vmem:[#allocation7 + $0xc8] sm:$0xff] %v161_v23  ;;  %226 = vst [vmem:[#allocation7 + $0xd0] sm:$0xff] %v162_v25  ;;  %v164_v36 = vadd.f32 %v493_v32, %v68_v29  ;;  %v165_v38 = vadd.f32 %v495_v35, %v69_v34  ;;  %v70_v39 = vld [vmem:[#allocation2 + $0xf0] sm:$0xff]  ;;  %v71_v43 = vld [vmem:[#allocation2 + $0xf8] sm:$0xff] }
  0x3e   :  { %v499_v41 = vld [vmem:[#allocation5 + $0xf0] sm:$0xff]  ;;  %v502_v45 = vld [vmem:[#allocation5 + $0xf8] sm:$0xff]  ;;  %v72_v47 = vld [vmem:[#allocation2 + $0x100] sm:$0xff] }
  0x3f   :  { %227 = vst [vmem:[#allocation7 + $0xd8] sm:$0xff] %v163_v30  ;;  %v166_v44 = vadd.f32 %v499_v41, %v70_v39  ;;  %v73_v48 = vld [vmem:[#allocation2 + $0x108] sm:$0xff]  ;;  %228 = vst [vmem:[#allocation7 + $0xe0] sm:$0xff] %v164_v36  ;;  %v167_v50 = vadd.f32 %v502_v45, %v71_v43  ;;  %v168_v52 = vadd.f32 %v409_v1, %v72_v47  ;;  %v74_v54 = vld [vmem:[#allocation2 + $0x110] sm:$0xff] }
  0x40   :  { %229 = vst [vmem:[#allocation7 + $0xe8] sm:$0xff] %v165_v38  ;;  %v169_v53 = vadd.f32 %v412_v4, %v73_v48  ;;  %v75_v56 = vld [vmem:[#allocation2 + $0x118] sm:$0xff]  ;;  %v76_v57 = vld [vmem:[#allocation2 + $0x120] sm:$0xff]  ;;  %v170_v59 = vadd.f32 %v414_v6, %v74_v54  ;;  %v77_v63 = vld [vmem:[#allocation2 + $0x128] sm:$0xff] }
  0x41   :  { %230 = vst [vmem:[#allocation7 + $0xf0] sm:$0xff] %v166_v44  ;;  %v171_v61 = vadd.f32 %v418_v10, %v75_v56  ;;  %v172_v62 = vadd.f32 %v421_v13, %v76_v57  ;;  %v78_v2 = vld [vmem:[#allocation2 + $0x130] sm:$0xff]  ;;  %v79_v3 = vld [vmem:[#allocation2 + $0x138] sm:$0xff]  ;;  %231 = vst [vmem:[#allocation7 + $0xf8] sm:$0xff] %v167_v50  ;;  %v173_v1 = vadd.f32 %v423_v15, %v77_v63 }
  0x42   :  { %232 = vst [vmem:[#allocation7 + $0x100] sm:$0xff] %v168_v52  ;;  %233 = vst [vmem:[#allocation7 + $0x108] sm:$0xff] %v169_v53  ;;  %v174_v4 = vadd.f32 %v427_v19, %v78_v2  ;;  %v175_v7 = vadd.f32 %v430_v22, %v79_v3  ;;  %v80_v9 = vld [vmem:[#allocation2 + $0x140] sm:$0xff]  ;;  %v81_v11 = vld [vmem:[#allocation2 + $0x148] sm:$0xff] }
  0x43   :  { %v82_v12 = vld [vmem:[#allocation2 + $0x150] sm:$0xff]  ;;  %234 = vst [vmem:[#allocation7 + $0x110] sm:$0xff] %v170_v59  ;;  %235 = vst [vmem:[#allocation7 + $0x118] sm:$0xff] %v171_v61  ;;  %v176_v6 = vadd.f32 %v432_v24, %v80_v9  ;;  %v177_v10 = vadd.f32 %v436_v28, %v81_v11  ;;  %v83_v16 = vld [vmem:[#allocation2 + $0x158] sm:$0xff] }
  0x44   :  { %236 = vst [vmem:[#allocation7 + $0x120] sm:$0xff] %v172_v62  ;;  %v178_v13 = vadd.f32 %v439_v31, %v82_v12  ;;  %v84_v17 = vld [vmem:[#allocation2 + $0x160] sm:$0xff]  ;;  %v85_v20 = vld [vmem:[#allocation2 + $0x168] sm:$0xff]  ;;  %237 = vst [vmem:[#allocation7 + $0x128] sm:$0xff] %v173_v1  ;;  %v179_v15 = vadd.f32 %v441_v33, %v83_v16 }
  0x45   :  { %238 = vst [vmem:[#allocation7 + $0x130] sm:$0xff] %v174_v4  ;;  %239 = vst [vmem:[#allocation7 + $0x138] sm:$0xff] %v175_v7  ;;  %v180_v19 = vadd.f32 %v445_v37, %v84_v17  ;;  %v181_v22 = vadd.f32 %v448_v40, %v85_v20  ;;  %v86_v23 = vld [vmem:[#allocation2 + $0x170] sm:$0xff]  ;;  %v87_v25 = vld [vmem:[#allocation2 + $0x178] sm:$0xff] }
  0x46   :  { %v88_v26 = vld [vmem:[#allocation2 + $0x180] sm:$0xff]  ;;  %240 = vst [vmem:[#allocation7 + $0x140] sm:$0xff] %v176_v6  ;;  %241 = vst [vmem:[#allocation7 + $0x148] sm:$0xff] %v177_v10  ;;  %v182_v24 = vadd.f32 %v450_v42, %v86_v23  ;;  %v183_v28 = vadd.f32 %v454_v46, %v87_v25  ;;  %v89_v29 = vld [vmem:[#allocation2 + $0x188] sm:$0xff] }
  0x47   :  { %242 = vst [vmem:[#allocation7 + $0x150] sm:$0xff] %v178_v13  ;;  %v184_v31 = vadd.f32 %v457_v49, %v88_v26  ;;  %v90_v30 = vld [vmem:[#allocation2 + $0x190] sm:$0xff]  ;;  %v91_v34 = vld [vmem:[#allocation2 + $0x198] sm:$0xff]  ;;  %243 = vst [vmem:[#allocation7 + $0x158] sm:$0xff] %v179_v15  ;;  %v185_v33 = vadd.f32 %v459_v51, %v89_v29 }
  0x48   :  { %244 = vst [vmem:[#allocation7 + $0x160] sm:$0xff] %v180_v19  ;;  %245 = vst [vmem:[#allocation7 + $0x168] sm:$0xff] %v181_v22  ;;  %v186_v37 = vadd.f32 %v463_v55, %v90_v30  ;;  %v187_v40 = vadd.f32 %v466_v58, %v91_v34  ;;  %v92_v36 = vld [vmem:[#allocation2 + $0x1a0] sm:$0xff]  ;;  %v93_v38 = vld [vmem:[#allocation2 + $0x1a8] sm:$0xff] }
  0x49   :  { %v94_v39 = vld [vmem:[#allocation2 + $0x1b0] sm:$0xff]  ;;  %246 = vst [vmem:[#allocation7 + $0x170] sm:$0xff] %v182_v24  ;;  %247 = vst [vmem:[#allocation7 + $0x178] sm:$0xff] %v183_v28  ;;  %v188_v42 = vadd.f32 %v468_v60, %v92_v36  ;;  %v189_v46 = vadd.f32 %v472_v0, %v93_v38  ;;  %v95_v43 = vld [vmem:[#allocation2 + $0x1b8] sm:$0xff] }
  0x4a   :  { %248 = vst [vmem:[#allocation7 + $0x180] sm:$0xff] %v184_v31  ;;  %v190_v49 = vadd.f32 %v475_v5, %v94_v39  ;;  %v96_v44 = vld [vmem:[#allocation2 + $0x1c0] sm:$0xff]  ;;  %v97_v47 = vld [vmem:[#allocation2 + $0x1c8] sm:$0xff]  ;;  %249 = vst [vmem:[#allocation7 + $0x188] sm:$0xff] %v185_v33  ;;  %v191_v51 = vadd.f32 %v477_v8, %v95_v43 }
  0x4b   :  { %250 = vst [vmem:[#allocation7 + $0x190] sm:$0xff] %v186_v37  ;;  %251 = vst [vmem:[#allocation7 + $0x198] sm:$0xff] %v187_v40  ;;  %v192_v55 = vadd.f32 %v481_v14, %v96_v44  ;;  %v193_v58 = vadd.f32 %v484_v18, %v97_v47  ;;  %v98_v48 = vld [vmem:[#allocation2 + $0x1d0] sm:$0xff]  ;;  %v99_v60 = vld [vmem:[#allocation2 + $0x1d8] sm:$0xff] }
  0x4c   :  { %v100_v50 = vld [vmem:[#allocation2 + $0x1e0] sm:$0xff]  ;;  %252 = vst [vmem:[#allocation7 + $0x1a0] sm:$0xff] %v188_v42  ;;  %253 = vst [vmem:[#allocation7 + $0x1a8] sm:$0xff] %v189_v46  ;;  %v194_v0 = vadd.f32 %v486_v21, %v98_v48  ;;  %v195_v5 = vadd.f32 %v490_v27, %v99_v60  ;;  %v101_v53 = vld [vmem:[#allocation2 + $0x1e8] sm:$0xff] }
  0x4d   :  { %254 = vst [vmem:[#allocation7 + $0x1b0] sm:$0xff] %v190_v49  ;;  %v196_v52 = vadd.f32 %v493_v32, %v100_v50  ;;  %v102_v54 = vld [vmem:[#allocation2 + $0x1f0] sm:$0xff]  ;;  %v103_v56 = vld [vmem:[#allocation2 + $0x1f8] sm:$0xff]  ;;  %255 = vst [vmem:[#allocation7 + $0x1b8] sm:$0xff] %v191_v51  ;;  %v197_v8 = vadd.f32 %v495_v35, %v101_v53 }
  0x4e   :  { %256 = vst [vmem:[#allocation7 + $0x1c0] sm:$0xff] %v192_v55  ;;  %257 = vst [vmem:[#allocation7 + $0x1c8] sm:$0xff] %v193_v58  ;;  %v198_v14 = vadd.f32 %v499_v41, %v102_v54  ;;  %v199_v18 = vadd.f32 %v502_v45, %v103_v56 }
  0x4f   :  { %258 = vst [vmem:[#allocation7 + $0x1d0] sm:$0xff] %v194_v0  ;;  %259 = vst [vmem:[#allocation7 + $0x1d8] sm:$0xff] %v195_v5 }
  0x50   :  { %260 = vst [vmem:[#allocation7 + $0x1e0] sm:$0xff] %v196_v52  ;;  %261 = vst [vmem:[#allocation7 + $0x1e8] sm:$0xff] %v197_v8 }
  0x51   :  { %262 = vst [vmem:[#allocation7 + $0x1f0] sm:$0xff] %v198_v14  ;;  %263 = vst [vmem:[#allocation7 + $0x1f8] sm:$0xff] %v199_v18 }
  0x52   :  { %342 = shalt.err (!%p339_p6)
}
  0x53   :  { %s343_s10 = scalar_lea.hbm %s554_s2, 8192 }
  0x54   :  { %p344_p7 = scmp.ne.s32.totalorder %s554_s2, %s343_s10  ;;  %p347_p8 = scmp.lt.u32.totalorder %s343_s10, %s554_s2 }
  0x56   :  { %p349_p9 = pnand %p347_p8, %p344_p7 }
  0x58   :  { %352 = shalt.err (!%p349_p9)
}
  0x59   :  { %275 = dma.vmem_to_hbm [thread:$0]  %s270_s6, 8192, %s554_s2, [#allocation4], %s360_s19, %s360_s19, %s361_s20  }
  0x5a   :  { %357 = dma.done.wait [#allocation4], 8192  }
  0x5b   :  { %358 = vsyncadd [#allocation4], 4294959104 }
  0x5c   :  { %279 = vsyncpa [#allocation3], 1 }
  0x5d   :  { %280 = vsyncpa [#allocation6], 1 }
  0x5e   :  { %281 = vsyncpa [#allocation4], 1 }

</bundles_post_ra>
